<compile_context>
chip_gen: v7x
topology: tpu7x:2x2x1
jax: 0.10.0
libtpu: 0.0.40
codegen_flags: <defaults>
</compile_context>

<pallas_src>
import numpy as np
import jax
import jax.numpy as jnp
from jax import lax
from jax.experimental import pallas as pl
from jax.experimental.pallas import tpu as pltpu

EMBED_SIZE = 768  # sizes['bert']
LN_EPS = 1e-12    # BERT LayerNorm epsilon


def _round_up(x, m):
    return (x + m - 1) // m * m


def bert_embed_kernel(ids_ref, pos_ids_ref, word_ref, pos_ref, gamma_ref, beta_ref, o_ref):
    tm = ids_ref.shape[0]
    V = word_ref.shape[0]
    P = pos_ref.shape[0]

    ids = ids_ref[...]          # (TM, 1) int32
    pos_ids = pos_ids_ref[...]  # (TM, 1) int32

    # One-hot gather on the MXU: tables are VMEM-resident across all tiles
    # (constant index_map), so there is no per-row HBM traffic.
    word_oh = (ids == lax.broadcasted_iota(jnp.int32, (tm, V), 1)).astype(jnp.float32)
    pos_oh = (pos_ids == lax.broadcasted_iota(jnp.int32, (tm, P), 1)).astype(jnp.float32)

    x = jnp.dot(word_oh, word_ref[...], preferred_element_type=jnp.float32)
    x = x + jnp.dot(pos_oh, pos_ref[...], preferred_element_type=jnp.float32)

    # BERT LayerNorm.
    mu = jnp.mean(x, axis=-1, keepdims=True)
    xc = x - mu
    var = jnp.mean(xc * xc, axis=-1, keepdims=True)
    y = xc * lax.rsqrt(var + LN_EPS)
    o_ref[...] = (y * gamma_ref[...] + beta_ref[...]).astype(o_ref.dtype)


def bert_embeddings(token_ids, word_emb, pos_emb, type_emb, gamma, beta, *, tm=256):
    """token_ids: (seq, batch) int32 BERT vocab ids -> (seq, batch, 768) f32."""
    seq, batch = token_ids.shape
    V, E = word_emb.shape
    P = pos_emb.shape[0]
    n = seq * batch

    # Fold the (constant) token-type-0 embedding into the position table.
    pos_fused = pos_emb + type_emb[0][None, :]

    # Flatten (seq, batch) -> flat token axis; position of flat row i is i // batch.
    ids_flat = jnp.clip(token_ids.reshape(-1).astype(jnp.int32), 0, V - 1)
    pos_flat = jnp.clip(jnp.arange(n, dtype=jnp.int32) // batch, 0, P - 1)

    # Tile size: multiple of 8 (sublane constraint), capped at 256 rows/tile.
    tm = min(tm, _round_up(n, 8))
    n_pad = _round_up(n, tm)
    pad = n_pad - n
    if pad:
        ids_flat = jnp.concatenate([ids_flat, jnp.zeros((pad,), jnp.int32)])
        pos_flat = jnp.concatenate([pos_flat, jnp.zeros((pad,), jnp.int32)])

    ids_2d = ids_flat.reshape(n_pad, 1)
    pos_2d = pos_flat.reshape(n_pad, 1)

    out_flat = pl.pallas_call(
        bert_embed_kernel,
        out_shape=jax.ShapeDtypeStruct((n_pad, E), jnp.float32),
        grid_spec=pltpu.PrefetchScalarGridSpec(
            num_scalar_prefetch=0,
            grid=(n_pad // tm,),
            in_specs=[
                # token ids / position ids for this tile
                pl.BlockSpec((tm, 1), lambda t: (t, 0)),
                pl.BlockSpec((tm, 1), lambda t: (t, 0)),
                # VMEM-resident tables / LayerNorm params (constant block index)
                pl.BlockSpec((V, E), lambda t: (0, 0)),
                pl.BlockSpec((P, E), lambda t: (0, 0)),
                pl.BlockSpec((1, E), lambda t: (0, 0)),
                pl.BlockSpec((1, E), lambda t: (0, 0)),
            ],
            out_specs=pl.BlockSpec((tm, E), lambda t: (t, 0)),
        ),
        compiler_params=pltpu.CompilerParams(
            dimension_semantics=("parallel",)),
    )(ids_2d, pos_2d, word_emb, pos_fused, gamma, beta)

    return out_flat[:n].reshape(seq, batch, E)


def _reference(token_ids, word_emb, pos_emb, type_emb, gamma, beta):
    seq, batch = token_ids.shape
    pos = jnp.arange(seq)[:, None] * jnp.ones((1, batch), jnp.int32)
    x = word_emb[token_ids] + pos_emb[pos.astype(jnp.int32)] + type_emb[0][None, None, :]
    mu = jnp.mean(x, axis=-1, keepdims=True)
    var = jnp.mean((x - mu) ** 2, axis=-1, keepdims=True)
    return (x - mu) * lax.rsqrt(var + LN_EPS) * gamma[0] + beta[0]


if __name__ == "__main__":
    seq, batch = 8, 2
    bert_vocab = 128
    max_pos = 16
    E = EMBED_SIZE

    # --- module vocab / idx2word, mirroring Bert.proc() ------------------
    idx2word = ["the", "cat", "sat", ".", "on", "__", "mat", "dog", "ran", "far"]
    SEP_ID, MASK_ID = 102, 103
    # glue: deterministic word -> BERT-vocab-id remap ('.' -> [SEP], '__' -> [MASK])
    bert_id_of_idx = np.array(
        [SEP_ID if w == "." else MASK_ID if w == "__" else 5 + i
         for i, w in enumerate(idx2word)], dtype=np.int32)

    # --- deterministic parameters ----------------------------------------
    key = jax.random.PRNGKey(0)
    k_w, k_p, k_t, k_ids = jax.random.split(key, 4)
    word_emb = jax.random.normal(k_w, (bert_vocab, E), jnp.float32) * 0.02
    pos_emb = jax.random.normal(k_p, (max_pos, E), jnp.float32) * 0.02
    type_emb = jax.random.normal(k_t, (2, E), jnp.float32) * 0.02
    gamma = jnp.ones((1, E), jnp.float32)
    beta = jnp.zeros((1, E), jnp.float32)

    # --- example input: (seq, batch) token indices into idx2word ----------
    token_idx = jax.random.randint(k_ids, (seq, batch), 0, len(idx2word), jnp.int32)
    bert_ids = jnp.asarray(bert_id_of_idx)[token_idx]  # glue: proc()/tokenization remap

    out = bert_embeddings(bert_ids, word_emb, pos_emb, type_emb, gamma, beta)
    out = jax.block_until_ready(out)

    assert out.shape == (seq, batch, E), out.shape
    ref = _reference(bert_ids, word_emb, pos_emb, type_emb, gamma, beta)
    assert jnp.allclose(out, ref, rtol=1e-4, atol=1e-4)

    print("KERNEL_OK")
</pallas_src>

<mosaic_0001>
module attributes {stable_mosaic.version = 11 : i64} {
  func.func @bert_embed_kernel(%arg0: i32, %arg1: memref<16x1xi32, #tpu.memory_space<vmem>>, %arg2: memref<16x1xi32, #tpu.memory_space<vmem>>, %arg3: memref<128x768xf32, #tpu.memory_space<vmem>>, %arg4: memref<16x768xf32, #tpu.memory_space<vmem>>, %arg5: memref<1x768xf32, #tpu.memory_space<vmem>>, %arg6: memref<1x768xf32, #tpu.memory_space<vmem>>, %arg7: memref<16x768xf32, #tpu.memory_space<vmem>>) attributes {dimension_semantics = [#tpu.dimension_semantics<parallel>], iteration_bounds = array<i64: 1>, scalar_prefetch = 0 : i64, scratch_operands = 0 : i64, tpu.core_type = #tpu.core_type<tc>, window_params = [{transform_indices = @transform_0, window_bounds = array<i64: 16, 1>}, {transform_indices = @transform_1, window_bounds = array<i64: 16, 1>}, {pipeline_mode = #tpu.pipeline_mode<synchronous>, transform_indices = @transform_2, window_bounds = array<i64: 128, 768>}, {pipeline_mode = #tpu.pipeline_mode<synchronous>, transform_indices = @transform_3, window_bounds = array<i64: 16, 768>}, {pipeline_mode = #tpu.pipeline_mode<synchronous>, transform_indices = @transform_4, window_bounds = array<i64: 1, 768>}, {pipeline_mode = #tpu.pipeline_mode<synchronous>, transform_indices = @transform_5, window_bounds = array<i64: 1, 768>}, {transform_indices = @transform_6, window_bounds = array<i64: 16, 768>}]} {
    %c0 = arith.constant 0 : index
    %c0_0 = arith.constant 0 : index
    %0 = vector.load %arg1[%c0, %c0_0] : memref<16x1xi32, #tpu.memory_space<vmem>>, vector<16x1xi32>
    %c0_1 = arith.constant 0 : index
    %c0_2 = arith.constant 0 : index
    %1 = vector.load %arg2[%c0_1, %c0_2] : memref<16x1xi32, #tpu.memory_space<vmem>>, vector<16x1xi32>
    %2 = tpu.iota {dimensions = array<i32: 1>} : vector<16x128xi32>
    %3 = vector.broadcast %0 : vector<16x1xi32> to vector<16x128xi32>
    %4 = arith.cmpi eq, %3, %2 : vector<16x128xi32>
    %5 = arith.extui %4 : vector<16x128xi1> to vector<16x128xi32>
    %6 = arith.sitofp %5 : vector<16x128xi32> to vector<16x128xf32>
    %7 = tpu.iota {dimensions = array<i32: 1>} : vector<16x16xi32>
    %8 = vector.broadcast %1 : vector<16x1xi32> to vector<16x16xi32>
    %9 = arith.cmpi eq, %8, %7 : vector<16x16xi32>
    %10 = arith.extui %9 : vector<16x16xi1> to vector<16x16xi32>
    %11 = arith.sitofp %10 : vector<16x16xi32> to vector<16x16xf32>
    %c0_3 = arith.constant 0 : index
    %c0_4 = arith.constant 0 : index
    %12 = vector.load %arg3[%c0_3, %c0_4] : memref<128x768xf32, #tpu.memory_space<vmem>>, vector<128x768xf32>
    %cst = arith.constant dense<0.000000e+00> : vector<16x768xf32>
    %13 = tpu.matmul %6, %12, %cst {dimension_numbers = #tpu.dot_dimension_numbers<[1], [0], [0], [1], [0, 0, 1, 1], [], []>} : vector<16x128xf32>, vector<128x768xf32>, vector<16x768xf32> -> vector<16x768xf32>
    %c0_5 = arith.constant 0 : index
    %c0_6 = arith.constant 0 : index
    %14 = vector.load %arg4[%c0_5, %c0_6] : memref<16x768xf32, #tpu.memory_space<vmem>>, vector<16x768xf32>
    %cst_7 = arith.constant dense<0.000000e+00> : vector<16x768xf32>
    %15 = tpu.matmul %11, %14, %cst_7 {dimension_numbers = #tpu.dot_dimension_numbers<[1], [0], [0], [1], [0, 0, 1, 1], [], []>} : vector<16x16xf32>, vector<16x768xf32>, vector<16x768xf32> -> vector<16x768xf32>
    %16 = arith.addf %13, %15 : vector<16x768xf32>
    %cst_8 = arith.constant dense<0.000000e+00> : vector<16xf32>
    %17 = vector.multi_reduction <add>, %16, %cst_8 [1] : vector<16x768xf32> to vector<16xf32>
    %18 = vector.shape_cast %17 : vector<16xf32> to vector<16x1xf32>
    %cst_9 = arith.constant 7.680000e+02 : f32
    %19 = vector.broadcast %cst_9 : f32 to vector<16x1xf32>
    %20 = arith.divf %18, %19 : vector<16x1xf32>
    %21 = vector.broadcast %20 : vector<16x1xf32> to vector<16x768xf32>
    %22 = arith.subf %16, %21 : vector<16x768xf32>
    %23 = arith.mulf %22, %22 : vector<16x768xf32>
    %cst_10 = arith.constant dense<0.000000e+00> : vector<16xf32>
    %24 = vector.multi_reduction <add>, %23, %cst_10 [1] : vector<16x768xf32> to vector<16xf32>
    %25 = vector.shape_cast %24 : vector<16xf32> to vector<16x1xf32>
    %cst_11 = arith.constant 7.680000e+02 : f32
    %26 = vector.broadcast %cst_11 : f32 to vector<16x1xf32>
    %27 = arith.divf %25, %26 : vector<16x1xf32>
    %cst_12 = arith.constant 9.99999996E-13 : f32
    %28 = vector.broadcast %cst_12 : f32 to vector<16x1xf32>
    %29 = arith.addf %27, %28 : vector<16x1xf32>
    %30 = math.rsqrt %29 : vector<16x1xf32>
    %31 = vector.broadcast %30 : vector<16x1xf32> to vector<16x768xf32>
    %32 = arith.mulf %22, %31 : vector<16x768xf32>
    %c0_13 = arith.constant 0 : index
    %c0_14 = arith.constant 0 : index
    %33 = vector.load %arg5[%c0_13, %c0_14] : memref<1x768xf32, #tpu.memory_space<vmem>>, vector<1x768xf32>
    %34 = vector.broadcast %33 : vector<1x768xf32> to vector<16x768xf32>
    %35 = arith.mulf %32, %34 : vector<16x768xf32>
    %c0_15 = arith.constant 0 : index
    %c0_16 = arith.constant 0 : index
    %36 = vector.load %arg6[%c0_15, %c0_16] : memref<1x768xf32, #tpu.memory_space<vmem>>, vector<1x768xf32>
    %37 = vector.broadcast %36 : vector<1x768xf32> to vector<16x768xf32>
    %38 = arith.addf %35, %37 : vector<16x768xf32>
    %c0_17 = arith.constant 0 : index
    %c0_18 = arith.constant 0 : index
    %39 = vector.load %arg7[%c0_17, %c0_18] : memref<16x768xf32, #tpu.memory_space<vmem>>, vector<16x768xf32>
    tpu.vector_store %arg7[%c0_17, %c0_18], %38 {strides = array<i32>} : memref<16x768xf32, #tpu.memory_space<vmem>>, vector<16x768xf32>,
    return
  }
  func.func @transform_0(%arg0: i32) -> (i32, i32) {
    %c0_i32 = arith.constant 0 : i32
    %c0_i32_0 = arith.constant 0 : i32
    return %arg0, %c0_i32 : i32, i32
  }
  func.func @transform_1(%arg0: i32) -> (i32, i32) {
    %c0_i32 = arith.constant 0 : i32
    %c0_i32_0 = arith.constant 0 : i32
    return %arg0, %c0_i32 : i32, i32
  }
  func.func @transform_2(%arg0: i32) -> (i32, i32) {
    %c0_i32 = arith.constant 0 : i32
    %c0_i32_0 = arith.constant 0 : i32
    %c0_i32_1 = arith.constant 0 : i32
    return %c0_i32, %c0_i32_0 : i32, i32
  }
  func.func @transform_3(%arg0: i32) -> (i32, i32) {
    %c0_i32 = arith.constant 0 : i32
    %c0_i32_0 = arith.constant 0 : i32
    %c0_i32_1 = arith.constant 0 : i32
    return %c0_i32, %c0_i32_0 : i32, i32
  }
  func.func @transform_4(%arg0: i32) -> (i32, i32) {
    %c0_i32 = arith.constant 0 : i32
    %c0_i32_0 = arith.constant 0 : i32
    %c0_i32_1 = arith.constant 0 : i32
    return %c0_i32, %c0_i32_0 : i32, i32
  }
  func.func @transform_5(%arg0: i32) -> (i32, i32) {
    %c0_i32 = arith.constant 0 : i32
    %c0_i32_0 = arith.constant 0 : i32
    %c0_i32_1 = arith.constant 0 : i32
    return %c0_i32, %c0_i32_0 : i32, i32
  }
  func.func @transform_6(%arg0: i32) -> (i32, i32) {
    %c0_i32 = arith.constant 0 : i32
    %c0_i32_0 = arith.constant 0 : i32
    return %arg0, %c0_i32 : i32, i32
  }
}

</mosaic_0001>

<bundles_post_ra>
// kernel: tpu_custom_call.1
= control target key start
LH: loop header
LB: loop body
LE: loop exit
PB: predicated region body
PF: predicated region fallthrough
CT: control target
= control target key end

     0   :  { %11 = vsyncpa [#allocation3], 0  ;;  %s1291_s0 = inlined_call_operand.vmem [shape: s32[16,1], index: 0, kind: input, shape index: {}]   ;;  %s1292_s1 = inlined_call_operand.vmem [shape: s32[16,1], index: 1, kind: input, shape index: {}]   ;;  %s1293_s2 = inlined_call_operand.hbm [shape: f32[128,768], index: 2, kind: input, shape index: {}]   ;;  %s1294_s3 = inlined_call_operand.hbm [shape: f32[16,768], index: 3, kind: input, shape index: {}]   ;;  %s1295_s4 = inlined_call_operand.vmem [shape: f32[1,768], index: 4, kind: input, shape index: {}]   ;;  %s1296_s5 = inlined_call_operand.vmem [shape: f32[1,768], index: 5, kind: input, shape index: {}]   ;;  %s1297_s6 = inlined_call_operand.hbm [shape: f32[16,768], index: 6, kind: output, shape index: {}]  }
   0x1   :  { %12 = vsyncpa [#allocation6], 0 }
   0x2   :  { %13 = vsyncpa [#allocation4], 0  ;;  %s1072_s21 = smov [#allocation2]   ;;  %s1000_s25 = scalar_lea.hbm %s1293_s2, 12288 }
   0x3   :  { %s23_s22 = sshll.u32 %s1072_s21, 4  ;;  %p1001_p0 = scmp.ne.s32.totalorder %s1293_s2, %s1000_s25  ;;  %s24_s22 = int_to_ptr.vmem [resolvable:$true] %s23_s22 }
   0x4   :  { %p1004_p1 = scmp.lt.u32.totalorder %s1000_s25, %s1293_s2 }
   0x6   :  { %p1006_p2 = pnand %p1004_p1, %p1001_p0 }
   0x8   :  { %1009 = shalt.err (!%p1006_p2)
}
   0x9   :  { %s1010_s30 = scalar_lea.vmem %s24_s22, 12288  ;;  %p1015_p4 = scmp.lt.s32.totalorder %s24_s22, %s24_s22 }
   0xa   :  { %p1011_p3 = scmp.ne.s32.totalorder %s24_s22, %s1010_s30  ;;  %p1016_p5 = scmp.lt.s32.totalorder %s1010_s30, %s1010_s30 }
   0xc   :  { %p1017_p6 = por %p1016_p5, %p1015_p4 }
   0xe   :  { %p1018_p7 = pnand %p1017_p6, %p1011_p3 }
  0x10   :  { %1021 = shalt.err (!%p1018_p7)
}
  0x11   :  { %s1073_s7 = smov 768   ;;  %s1074_s8 = smov 48  }
  0x12   :  { %29 = dma.hbm_to_vmem [thread:$0]  %s1293_s2, 12288, %s24_s22, [#allocation3], %s1073_s7, %s1073_s7, %s1074_s8  }
  0x13   :  { %s1075_s11 = smov [#allocation5]   ;;  %s1022_s15 = scalar_lea.hbm %s1294_s3, 1536 }
  0x14   :  { %s35_s12 = sshll.u32 %s1075_s11, 4  ;;  %p1023_p8 = scmp.ne.s32.totalorder %s1294_s3, %s1022_s15  ;;  %s36_s12 = int_to_ptr.vmem [resolvable:$true] %s35_s12 }
  0x15   :  { %p1026_p9 = scmp.lt.u32.totalorder %s1022_s15, %s1294_s3 }
  0x17   :  { %p1028_p10 = pnand %p1026_p9, %p1023_p8 }
  0x19   :  { %1031 = shalt.err (!%p1028_p10)
}
  0x1a   :  { %s1032_s20 = scalar_lea.vmem %s36_s12, 1536  ;;  %p1037_p12 = scmp.lt.s32.totalorder %s36_s12, %s36_s12 }
  0x1b   :  { %p1033_p11 = scmp.ne.s32.totalorder %s36_s12, %s1032_s20  ;;  %p1038_p13 = scmp.lt.s32.totalorder %s1032_s20, %s1032_s20 }
  0x1d   :  { %p1039_p0 = por %p1038_p13, %p1037_p12 }
  0x1f   :  { %p1040_p1 = pnand %p1039_p0, %p1033_p11 }
  0x21   :  { %1043 = shalt.err (!%p1040_p1)
}
  0x22   :  { %41 = dma.hbm_to_vmem [thread:$0]  %s1294_s3, 1536, %s36_s12, [#allocation6], %s1073_s7, %s1073_s7, %s1074_s8  }
  0x23   :  { %1066 = dma.done.wait [#allocation3], 12288  }
  0x24   :  { %1067 = vsyncadd [#allocation3], 4294955008 }
  0x25   :  { %1068 = dma.done.wait [#allocation6], 1536  }
  0x26   :  { %1069 = vsyncadd [#allocation6], 4294965760  ;;  %v1076_v0 = vmov 0   ;;  %v1077_v1 = vmov 0.0   ;;  %v54_v2 = vld [vmem:[%s1292_s1] sm:$0xff]  ;;  %v55_v4 = vld [vmem:[%s1292_s1 + $0x8] sm:$0xff] }
  0x27   :  { %995 = vset.pattern.permute.xlu1 %v1076_v0  ;;  %994 = vset.pattern.permute.xlu0 %v1076_v0  ;;  %v52_v3 = vld [vmem:[%s1291_s0] sm:$0xff]  ;;  %v53_v5 = vld [vmem:[%s1291_s0 + $0x8] sm:$0xff]  ;;  %v83_v6 = vld [vmem:[#allocation2 + $0x8] sm:$0xff]  ;;  %vm190_vm0 = vcmask 130048  }
  0x28   :  { %492 = vmatprep.mubr.f32.mxu0 %v1077_v1  ;;  %261 = vmatprep.mubr.f32.mxu1 %v1077_v1  ;;  %v89_v7 = vld [vmem:[#allocation2 + $0x38] sm:$0xff]  ;;  %v82_v9 = vld [vmem:[#allocation2] sm:$0xff]  ;;  %v88_v10 = vld [vmem:[#allocation2 + $0x30] sm:$0xff] }
  0x29   :  { %71 = vperm.xlu0 %994, %v54_v2   ;;  %59 = vperm.xlu1 %995, %v52_v3   ;;  %v878_v8 = vpack.c.bf16 %v89_v7, %v83_v6  ;;  %v95_v11 = vld [vmem:[#allocation2 + $0x68] sm:$0xff]  ;;  %v880_v12 = vpack.c.bf16 %v88_v10, %v82_v9  ;;  %v101_v13 = vld [vmem:[#allocation2 + $0x98] sm:$0xff]  ;;  %v94_v14 = vld [vmem:[#allocation2 + $0x60] sm:$0xff]  ;;  %v56_v3 = vlaneseq }
  0x2a   :  { %v100_v15 = vld [vmem:[#allocation2 + $0x90] sm:$0xff]  ;;  %v882_v16 = vpack.c.bf16 %v101_v13, %v95_v11  ;;  %v107_v17 = vld [vmem:[#allocation2 + $0xc8] sm:$0xff]  ;;  %v113_v18 = vld [vmem:[#allocation2 + $0xf8] sm:$0xff] }
  0x2b   :  { %879 = vmatprep.subr.bf16.mxu0 %v878_v8  ;;  %v884_v19 = vpack.c.bf16 %v100_v15, %v94_v14  ;;  %v886_v20 = vpack.c.bf16 %v113_v18, %v107_v17  ;;  %v106_v21 = vld [vmem:[#allocation2 + $0xc0] sm:$0xff]  ;;  %v112_v22 = vld [vmem:[#allocation2 + $0xf0] sm:$0xff]  ;;  %v119_v23 = vld [vmem:[#allocation2 + $0x128] sm:$0xff]  ;;  %v1160_v7 = vand.u32 127, %v56_v3 }
  0x2c   :  { %881 = vmatpush1.bf16.msra.mxu0 %v880_v12  ;;  %v125_v24 = vld [vmem:[#allocation2 + $0x158] sm:$0xff]  ;;  %v888_v25 = vpack.c.bf16 %v112_v22, %v106_v21  ;;  %v118_v26 = vld [vmem:[#allocation2 + $0x120] sm:$0xff]  ;;  %v124_v28 = vld [vmem:[#allocation2 + $0x150] sm:$0xff] }
  0x2d   :  { %74 = vperm.xlu0 %994, %v55_v4   ;;  %62 = vperm.xlu1 %995, %v53_v5   ;;  %v890_v27 = vpack.c.bf16 %v125_v24, %v119_v23  ;;  %v179_v29 = vld [vmem:[#allocation5 + $0x8] sm:$0xff]  ;;  %v185_v30 = vld [vmem:[#allocation5 + $0x38] sm:$0xff]  ;;  %v178_v34 = vld [vmem:[#allocation5] sm:$0xff]  ;;  %v892_v36 = vpack.c.bf16 %v124_v28, %v118_v26  ;;  %v1078_v23 = vmov 1.0  }
  0x2e   :  { %883 = vmatprep.subr.bf16.mxu0 %v882_v16  ;;  %v131_v31 = vld [vmem:[#allocation2 + $0x188] sm:$0xff]  ;;  %v137_v32 = vld [vmem:[#allocation2 + $0x1b8] sm:$0xff]  ;;  %v866_v33 = vpack.c.bf16 %v185_v30, %v179_v29  ;;  %v184_v35 = vld [vmem:[#allocation5 + $0x30] sm:$0xff] }
  0x2f   :  { %v868_v37 = vpack.c.bf16 %v184_v35, %v178_v34  ;;  %v181_v38 = vld [vmem:[#allocation5 + $0x18] sm:$0xff]  ;;  %v894_v39 = vpack.c.bf16 %v137_v32, %v131_v31  ;;  %v130_v40 = vld [vmem:[#allocation2 + $0x180] sm:$0xff]  ;;  %v136_v41 = vld [vmem:[#allocation2 + $0x1b0] sm:$0xff] }
  0x30   :  { %885 = vmatpush1.bf16.msra.mxu0 %v884_v19  ;;  %867 = vmatprep.subr.bf16.mxu1 %v866_v33  ;;  %v187_v42 = vld [vmem:[#allocation5 + $0x48] sm:$0xff]  ;;  %v149_v44 = vld [vmem:[#allocation2 + $0x218] sm:$0xff]  ;;  %v896_v46 = vpack.c.bf16 %v136_v41, %v130_v40  ;;  %v142_v48 = vld [vmem:[#allocation2 + $0x1e0] sm:$0xff] }
  0x31   :  { %887 = vmatprep.subr.bf16.mxu0 %v886_v20  ;;  %v143_v43 = vld [vmem:[#allocation2 + $0x1e8] sm:$0xff]  ;;  %869 = vmatpush1.bf16.msra.mxu1 %v868_v37  ;;  %v870_v45 = vpack.c.bf16 %v187_v42, %v181_v38  ;;  %v148_v49 = vld [vmem:[#allocation2 + $0x210] sm:$0xff]  ;;  %v161_v51 = vld [vmem:[#allocation2 + $0x278] sm:$0xff] }
  0x32   :  { %v898_v47 = vpack.c.bf16 %v149_v44, %v143_v43  ;;  %v155_v50 = vld [vmem:[#allocation2 + $0x248] sm:$0xff]  ;;  %v900_v52 = vpack.c.bf16 %v148_v49, %v142_v48  ;;  %v154_v54 = vld [vmem:[#allocation2 + $0x240] sm:$0xff]  ;;  %v160_v55 = vld [vmem:[#allocation2 + $0x270] sm:$0xff] }
  0x33   :  { %871 = vmatprep.subr.bf16.mxu1 %v870_v45  ;;  %v902_v53 = vpack.c.bf16 %v161_v51, %v155_v50  ;;  %v167_v56 = vld [vmem:[#allocation2 + $0x2a8] sm:$0xff]  ;;  %v173_v57 = vld [vmem:[#allocation2 + $0x2d8] sm:$0xff]  ;;  %v904_v58 = vpack.c.bf16 %v160_v55, %v154_v54  ;;  %v166_v60 = vld [vmem:[#allocation2 + $0x2a0] sm:$0xff] }
  0x34   :  { %889 = vmatpush1.bf16.msra.mxu0 %v888_v25  ;;  %v906_v59 = vpack.c.bf16 %v173_v57, %v167_v56  ;;  %v172_v61 = vld [vmem:[#allocation2 + $0x2d0] sm:$0xff]  ;;  %v87_v62 = vld [vmem:[#allocation2 + $0x28] sm:$0xff]  ;;  %v93_v63 = vld [vmem:[#allocation2 + $0x58] sm:$0xff] }
  0x35   :  { %891 = vmatprep.subr.bf16.mxu0 %v890_v27  ;;  %v908_v0 = vpack.c.bf16 %v172_v61, %v166_v60  ;;  %v942_v2 = vpack.c.bf16 %v93_v63, %v87_v62  ;;  %v86_v4 = vld [vmem:[#allocation2 + $0x20] sm:$0xff]  ;;  %v92_v5 = vld [vmem:[#allocation2 + $0x50] sm:$0xff]  ;;  %v99_v9 = vld [vmem:[#allocation2 + $0x88] sm:$0xff] }
  0x36   :  { %v180_v6 = vld [vmem:[#allocation5 + $0x10] sm:$0xff]  ;;  %v186_v8 = vld [vmem:[#allocation5 + $0x40] sm:$0xff]  ;;  %v105_v10 = vld [vmem:[#allocation2 + $0xb8] sm:$0xff]  ;;  %v944_v11 = vpack.c.bf16 %v92_v5, %v86_v4 }
  0x37   :  { %v183_v12 = vld [vmem:[#allocation5 + $0x28] sm:$0xff]  ;;  %v189_v13 = vld [vmem:[#allocation5 + $0x58] sm:$0xff]  ;;  %v872_v16 = vpack.c.bf16 %v186_v8, %v180_v6  ;;  %v946_v17 = vpack.c.bf16 %v105_v10, %v99_v9  ;;  %v98_v18 = vld [vmem:[#allocation2 + $0x80] sm:$0xff] }
  0x38   :  { %893 = vmatpush1.bf16.msra.mxu0 %v892_v36  ;;  %v104_v19 = vld [vmem:[#allocation2 + $0xb0] sm:$0xff]  ;;  %v111_v20 = vld [vmem:[#allocation2 + $0xe8] sm:$0xff]  ;;  %v117_v21 = vld [vmem:[#allocation2 + $0x118] sm:$0xff]  ;;  %v874_v24 = vpack.c.bf16 %v189_v13, %v183_v12 }
  0x39   :  { %895 = vmatprep.subr.bf16.mxu0 %v894_v39  ;;  %v948_v25 = vpack.c.bf16 %v104_v19, %v98_v18  ;;  %v950_v28 = vpack.c.bf16 %v117_v21, %v111_v20  ;;  %v110_v29 = vld [vmem:[#allocation2 + $0xe0] sm:$0xff]  ;;  %v116_v30 = vld [vmem:[#allocation2 + $0x110] sm:$0xff]  ;;  %v123_v33 = vld [vmem:[#allocation2 + $0x148] sm:$0xff] }
  0x3a   :  { %v182_v31 = vld [vmem:[#allocation5 + $0x20] sm:$0xff]  ;;  %v188_v32 = vld [vmem:[#allocation5 + $0x50] sm:$0xff]  ;;  %v129_v34 = vld [vmem:[#allocation2 + $0x178] sm:$0xff]  ;;  %v952_v38 = vpack.c.bf16 %v116_v30, %v110_v29 }
  0x3b   :  { %v85_v36 = vld [vmem:[#allocation2 + $0x18] sm:$0xff]  ;;  %v91_v37 = vld [vmem:[#allocation2 + $0x48] sm:$0xff]  ;;  %v876_v39 = vpack.c.bf16 %v188_v32, %v182_v31  ;;  %v954_v40 = vpack.c.bf16 %v129_v34, %v123_v33  ;;  %v122_v41 = vld [vmem:[#allocation2 + $0x140] sm:$0xff] }
  0x3c   :  { %897 = vmatpush1.bf16.msra.mxu0 %v896_v46  ;;  %v128_v42 = vld [vmem:[#allocation2 + $0x170] sm:$0xff]  ;;  %v135_v43 = vld [vmem:[#allocation2 + $0x1a8] sm:$0xff]  ;;  %v141_v44 = vld [vmem:[#allocation2 + $0x1d8] sm:$0xff]  ;;  %v910_v45 = vpack.c.bf16 %v91_v37, %v85_v36 }
  0x3d   :  { %899 = vmatprep.subr.bf16.mxu0 %v898_v47  ;;  %v956_v46 = vpack.c.bf16 %v128_v42, %v122_v41  ;;  %v958_v47 = vpack.c.bf16 %v141_v44, %v135_v43  ;;  %v134_v48 = vld [vmem:[#allocation2 + $0x1a0] sm:$0xff]  ;;  %v140_v49 = vld [vmem:[#allocation2 + $0x1d0] sm:$0xff]  ;;  %v97_v54 = vld [vmem:[#allocation2 + $0x78] sm:$0xff] }
  0x3e   :  { %v84_v50 = vld [vmem:[#allocation2 + $0x10] sm:$0xff]  ;;  %v90_v51 = vld [vmem:[#allocation2 + $0x40] sm:$0xff]  ;;  %v103_v55 = vld [vmem:[#allocation2 + $0xa8] sm:$0xff]  ;;  %v960_v56 = vpack.c.bf16 %v140_v49, %v134_v48 }
  0x3f   :  { %v912_v57 = vpack.c.bf16 %v90_v51, %v84_v50  ;;  %v152_v60 = vld [vmem:[#allocation2 + $0x230] sm:$0xff]  ;;  %v914_v62 = vpack.c.bf16 %v103_v55, %v97_v54  ;;  %v102_v63 = vld [vmem:[#allocation2 + $0xa0] sm:$0xff]  ;;  %v109_v4 = vld [vmem:[#allocation2 + $0xd8] sm:$0xff] }
  0x40   :  { %901 = vmatpush1.bf16.msra.mxu0 %v900_v52  ;;  %v147_v52 = vld [vmem:[#allocation2 + $0x208] sm:$0xff]  ;;  %v96_v61 = vld [vmem:[#allocation2 + $0x70] sm:$0xff]  ;;  %v158_v10 = vld [vmem:[#allocation2 + $0x260] sm:$0xff] }
  0x41   :  { %903 = vmatprep.subr.bf16.mxu0 %v902_v53  ;;  %v153_v53 = vld [vmem:[#allocation2 + $0x238] sm:$0xff]  ;;  %v115_v5 = vld [vmem:[#allocation2 + $0x108] sm:$0xff]  ;;  %v916_v8 = vpack.c.bf16 %v102_v63, %v96_v61  ;;  %v108_v12 = vld [vmem:[#allocation2 + $0xd0] sm:$0xff] }
  0x42   :  { %v918_v13 = vpack.c.bf16 %v115_v5, %v109_v4  ;;  %v121_v18 = vld [vmem:[#allocation2 + $0x138] sm:$0xff]  ;;  %v127_v19 = vld [vmem:[#allocation2 + $0x168] sm:$0xff]  ;;  %v126_v29 = vld [vmem:[#allocation2 + $0x160] sm:$0xff] }
  0x43   :  { %v133_v30 = vld [vmem:[#allocation2 + $0x198] sm:$0xff]  ;;  %v139_v31 = vld [vmem:[#allocation2 + $0x1c8] sm:$0xff]  ;;  %v138_v36 = vld [vmem:[#allocation2 + $0x1c0] sm:$0xff] }
  0x44   :  { %905 = vmatpush1.bf16.msra.mxu0 %v904_v58  ;;  %v962_v58 = vpack.c.bf16 %v153_v53, %v147_v52  ;;  %v926_v34 = vpack.c.bf16 %v139_v31, %v133_v30  ;;  %v145_v37 = vld [vmem:[#allocation2 + $0x1f8] sm:$0xff]  ;;  %v144_v41 = vld [vmem:[#allocation2 + $0x1f0] sm:$0xff]  ;;  %v150_v42 = vld [vmem:[#allocation2 + $0x220] sm:$0xff] }
  0x45   :  { %907 = vmatprep.subr.bf16.mxu0 %v906_v59  ;;  %v146_v59 = vld [vmem:[#allocation2 + $0x200] sm:$0xff]  ;;  %v157_v43 = vld [vmem:[#allocation2 + $0x258] sm:$0xff]  ;;  %v163_v44 = vld [vmem:[#allocation2 + $0x288] sm:$0xff] }
  0x46   :  { %v964_v6 = vpack.c.bf16 %v152_v60, %v146_v59  ;;  %v162_v48 = vld [vmem:[#allocation2 + $0x280] sm:$0xff]  ;;  %v169_v49 = vld [vmem:[#allocation2 + $0x2b8] sm:$0xff]  ;;  %v175_v50 = vld [vmem:[#allocation2 + $0x2e8] sm:$0xff] }
  0x47   :  { %v938_v52 = vpack.c.bf16 %v175_v50, %v169_v49  ;;  %v168_v53 = vld [vmem:[#allocation2 + $0x2b0] sm:$0xff]  ;;  %v174_v54 = vld [vmem:[#allocation2 + $0x2e0] sm:$0xff] }
  0x48   :  { %909 = vmatpush1.bf16.msra.mxu0 %v908_v0  ;;  %v159_v0 = vld [vmem:[#allocation2 + $0x268] sm:$0xff]  ;;  %v940_v55 = vpack.c.bf16 %v174_v54, %v168_v53 }
  0x49   :  { %943 = vmatprep.subr.bf16.mxu0 %v942_v2  ;;  %v165_v2 = vld [vmem:[#allocation2 + $0x298] sm:$0xff] }
  0x4a   :  { %v966_v9 = vpack.c.bf16 %v165_v2, %v159_v0 }
  0xa8   :  { %v72_v14 = vpop.permute.xlu0 %71  ;;  %v1162_v15 = vpop.permute.xlu1 %59 }
  0xa9   :  { %vm76_vm1 = vcmp.eq.s32.totalorder %v72_v14, %v1160_v7  ;;  %vm64_vm2 = vcmp.eq.s32.totalorder %v1162_v15, %v1160_v7  ;;  %v114_v14 = vld [vmem:[#allocation2 + $0x100] sm:$0xff] }
  0xaa   :  { %v1168_v22 = vsel %vm76_vm1, 1.0, %v1077_v1  ;;  %860 = vmatmul.mubr.msk.f32.vlgmr.msra.gmra.mrb[0].mxu0 %vm64_vm2, %v1078_v23  ;;  %v920_v21 = vpack.c.bf16 %v114_v14, %v108_v12 }
  0xab   :  { %945 = vmatpush1.bf16.msra.mxu0 %v944_v11  ;;  %854 = vmatmul.mubr.msk.f32.vlgmr.msra.gmra.mrb[0].mxu1 %vm190_vm0, %v1168_v22  ;;  %v164_v11 = vld [vmem:[#allocation2 + $0x290] sm:$0xff] }
  0xac   :  { %873 = vmatpush1.bf16.msra.mxu1 %v872_v16  ;;  %v75_v26 = vpop.permute.xlu0 %74  ;;  %947 = vmatprep.subr.bf16.mxu0 %v946_v17  ;;  %v1176_v27 = vpop.permute.xlu1 %62  ;;  %v171_v16 = vld [vmem:[#allocation2 + $0x2c8] sm:$0xff]  ;;  %v177_v17 = vld [vmem:[#allocation2 + $0x2f8] sm:$0xff]  ;;  %v968_v20 = vpack.c.bf16 %v164_v11, %v158_v10 }
  0xad   :  { %vm77_vm3 = vcmp.eq.s32.totalorder %v75_v26, %v1160_v7  ;;  %vm65_vm4 = vcmp.eq.s32.totalorder %v1176_v27, %v1160_v7  ;;  %267 = vmatprep.mubr.f32.mxu1 %v1077_v1  ;;  %498 = vmatprep.mubr.f32.mxu0 %v1077_v1  ;;  %v922_v26 = vpack.c.bf16 %v127_v19, %v121_v18 }
  0xae   :  { %v1184_v35 = vsel %vm77_vm3, 1.0, %v1077_v1  ;;  %861 = vmatmul.mubr.msk.f32.gmra.mrb[2].mxu0 %vm65_vm4, %v1078_v23  ;;  %875 = vmatprep.subr.bf16.mxu1 %v874_v24  ;;  %v170_v24 = vld [vmem:[#allocation2 + $0x2c0] sm:$0xff] }
  0xaf   :  { %949 = vmatpush1.bf16.msra.mxu0 %v948_v25  ;;  %855 = vmatmul.mubr.msk.f32.gmra.mrb[2].mxu1 %vm190_vm0, %v1184_v35  ;;  %v176_v25 = vld [vmem:[#allocation2 + $0x2f0] sm:$0xff] }
  0xb0   :  { %951 = vmatprep.subr.bf16.mxu0 %v950_v28  ;;  %338 = vmatprep.mubr.f32.mxu1 %v1077_v1  ;;  %v120_v28 = vld [vmem:[#allocation2 + $0x130] sm:$0xff]  ;;  %v972_v32 = vpack.c.bf16 %v176_v25, %v170_v24 }
  0xb1   :  { %646 = vmatprep.mubr.f32.mxu0 %v1077_v1  ;;  %v924_v33 = vpack.c.bf16 %v126_v29, %v120_v28 }
  0xb3   :  { %953 = vmatpush1.bf16.msra.mxu0 %v952_v38  ;;  %856 = vmatmul.mubr.msk.f32.vlgmr.msra.gmra.mrb[4].mxu1 %vm190_vm0, %v1168_v22  ;;  %v151_v38 = vld [vmem:[#allocation2 + $0x228] sm:$0xff] }
  0xb4   :  { %877 = vmatpush1.bf16.msra.mxu1 %v876_v39  ;;  %955 = vmatprep.subr.bf16.mxu0 %v954_v40  ;;  %v930_v40 = vpack.c.bf16 %v151_v38, %v145_v37 }
  0xb5   :  { %344 = vmatprep.mubr.f32.mxu1 %v1077_v1  ;;  %911 = vmatprep.subr.bf16.mxu1 %v910_v45  ;;  %v932_v45 = vpack.c.bf16 %v150_v42, %v144_v41 }
  0xb7   :  { %957 = vmatpush1.bf16.msra.mxu0 %v956_v46  ;;  %857 = vmatmul.mubr.msk.f32.gmra.mrb[6].mxu1 %vm190_vm0, %v1184_v35  ;;  %v934_v46 = vpack.c.bf16 %v163_v44, %v157_v43 }
  0xb8   :  { %959 = vmatprep.subr.bf16.mxu0 %v958_v47  ;;  %415 = vmatprep.mubr.f32.mxu1 %v1077_v1  ;;  %v156_v47 = vld [vmem:[#allocation2 + $0x250] sm:$0xff] }
  0xb9   :  { %v936_v51 = vpack.c.bf16 %v162_v48, %v156_v47 }
  0xbb   :  { %961 = vmatpush1.bf16.msra.mxu0 %v960_v56  ;;  %858 = vmatmul.mubr.msk.f32.vlgmr.msra.gmra.mrb[8].mxu1 %vm190_vm0, %v1168_v22  ;;  %v970_v22 = vpack.c.bf16 %v177_v17, %v171_v16 }
  0xbc   :  { %913 = vmatpush1.bf16.msra.mxu1 %v912_v57  ;;  %963 = vmatprep.subr.bf16.mxu0 %v962_v58 }
  0xbd   :  { %421 = vmatprep.mubr.f32.mxu1 %v1077_v1  ;;  %915 = vmatprep.subr.bf16.mxu1 %v914_v62 }
  0xbf   :  { %965 = vmatpush1.bf16.msra.mxu0 %v964_v6  ;;  %859 = vmatmul.mubr.msk.f32.gmra.mrb[10].mxu1 %vm190_vm0, %v1184_v35  ;;  %v132_v35 = vld [vmem:[#allocation2 + $0x190] sm:$0xff] }
  0xc0   :  { %917 = vmatpush1.bf16.msra.mxu1 %v916_v8  ;;  %967 = vmatprep.subr.bf16.mxu0 %v966_v9  ;;  %v928_v39 = vpack.c.bf16 %v138_v36, %v132_v35 }
  0xc1   :  { %919 = vmatprep.subr.bf16.mxu1 %v918_v13  ;;  %569 = vmatprep.mubr.f32.mxu1 %v1077_v1 }
  0xc3   :  { %969 = vmatpush1.bf16.msra.mxu0 %v968_v20 }
  0xc4   :  { %921 = vmatpush1.bf16.msra.mxu1 %v920_v21  ;;  %971 = vmatprep.subr.bf16.mxu0 %v970_v22 }
  0xc5   :  { %923 = vmatprep.subr.bf16.mxu1 %v922_v26 }
  0xc7   :  { %973 = vmatpush1.bf16.msra.mxu0 %v972_v32 }
  0xc8   :  { %925 = vmatpush1.bf16.msra.mxu1 %v924_v33 }
  0xc9   :  { %927 = vmatprep.subr.bf16.mxu1 %v926_v34 }
  0xca   :  { %864 = vmatmul.mubr.msk.f32.vlgmr.msra.gmra.mrb[4].mxu0 %vm64_vm2, %v1078_v23 }
  0xcb   :  { %652 = vmatprep.mubr.f32.mxu0 %v1077_v1 }
  0xcc   :  { %929 = vmatpush1.bf16.msra.mxu1 %v928_v39 }
  0xcd   :  { %931 = vmatprep.subr.bf16.mxu1 %v930_v40 }
  0xce   :  { %865 = vmatmul.mubr.msk.f32.gmra.mrb[6].mxu0 %vm65_vm4, %v1078_v23 }
  0xd0   :  { %933 = vmatpush1.bf16.msra.mxu1 %v932_v45 }
  0xd1   :  { %935 = vmatprep.subr.bf16.mxu1 %v934_v46 }
  0xd4   :  { %937 = vmatpush1.bf16.msra.mxu1 %v936_v51 }
  0xd5   :  { %939 = vmatprep.subr.bf16.mxu1 %v938_v52 }
  0xd8   :  { %941 = vmatpush1.bf16.msra.mxu1 %v940_v55 }
  0xdb   :  { %862 = vmatmul.mubr.msk.f32.vlgmr.msra.gmra.mrb[4].mxu1 %vm64_vm2, %v1078_v23 }
  0xdc   :  { %575 = vmatprep.mubr.f32.mxu1 %v1077_v1 }
  0xdf   :  { %863 = vmatmul.mubr.msk.f32.gmra.mrb[6].mxu1 %vm65_vm4, %v1078_v23 }
 0x17d   :  { %v494_v56 = vpop.f32.mrb[0].mxu0 }
 0x17e   :  { %v263_v57 = vpop.f32.mrb[0].mxu1  ;;  %v496_v58 = vpop.f32.mrb[1].mxu0 }
 0x17f   :  { %v495_v59 = vadd.f32 %v494_v56, %v263_v57  ;;  %v265_v60 = vpop.f32.mrb[1].mxu1 }
 0x180   :  { %v497_v61 = vadd.f32 %v496_v58, %v265_v60 }
 0x181   :  { %v500_v62 = vpop.f32.mrb[2].mxu0 }
 0x182   :  { %v269_v63 = vpop.f32.mrb[2].mxu1  ;;  %v502_v0 = vpop.f32.mrb[3].mxu0  ;;  %v659_v14 = vadd.f32 %v497_v61, %v495_v59 }
 0x183   :  { %v501_v2 = vadd.f32 %v500_v62, %v269_v63  ;;  %v271_v4 = vpop.f32.mrb[3].mxu1 }
 0x184   :  { %v503_v15 = vadd.f32 %v502_v0, %v271_v4 }
 0x186   :  { %v666_v19 = vadd.f32 %v503_v15, %v501_v2 }
 0x18e   :  { %v417_v5 = vpop.f32.mrb[8].mxu1 }
 0x18f   :  { %v419_v6 = vpop.f32.mrb[9].mxu1 }
 0x192   :  { %v423_v1 = vpop.f32.mrb[10].mxu1 }
 0x193   :  { %v425_v8 = vpop.f32.mrb[11].mxu1 }
 0x19d   :  { %v648_v9 = vpop.f32.mrb[4].mxu0 }
 0x19e   :  { %v649_v10 = vadd.f32 %v648_v9, %v417_v5  ;;  %v650_v7 = vpop.f32.mrb[5].mxu0 }
 0x19f   :  { %v651_v23 = vadd.f32 %v650_v7, %v419_v6  ;;  %v735_v7 = vshrl.u32 %v56_v3, 7 }
 0x1a1   :  { %v654_v27 = vpop.f32.mrb[6].mxu0 }
 0x1a2   :  { %v655_v11 = vadd.f32 %v654_v27, %v423_v1  ;;  %v656_v12 = vpop.f32.mrb[7].mxu0  ;;  %v736_v27 = vsub.s32 0, %v735_v7 }
 0x1a3   :  { %v657_v13 = vadd.f32 %v656_v12, %v425_v8  ;;  %v744_v12 = vsub.s32 2, %v735_v7 }
 0x1ae   :  { %v571_v16 = vpop.f32.mrb[4].mxu1 }
 0x1af   :  { %v660_v17 = vadd.f32 %v659_v14, %v571_v16  ;;  %v573_v18 = vpop.f32.mrb[5].mxu1  ;;  %v732_v14 = vld [vmem:[%s1295_s4] sm:$0x3f]  ;;  %s1079_s4 = smov [#allocation7]  }
 0x1b1   :  { %v661_v20 = vadd.f32 %v660_v17, %v573_v18  ;;  %v756_v17 = vsub.s32 5, %v735_v7 }
 0x1b2   :  { %v577_v21 = vpop.f32.mrb[6].mxu1 }
 0x1b3   :  { %v667_v22 = vadd.f32 %v666_v19, %v577_v21  ;;  %v579_v24 = vpop.f32.mrb[7].mxu1  ;;  %v662_v25 = vadd.f32 %v661_v20, %v649_v10  ;;  %v737_v19 = vrot.slane %v732_v14, %v736_v27 }
 0x1b5   :  { %v668_v26 = vadd.f32 %v667_v22, %v579_v24  ;;  %v663_v28 = vadd.f32 %v662_v25, %v651_v23  ;;  %v757_v25 = vrot.slane %v732_v14, %v756_v17 }
 0x1b7   :  { %v669_v29 = vadd.f32 %v668_v26, %v655_v11  ;;  %664 = vadd.xlane.f32.xlu0 %v663_v28 }
 0x1b9   :  { %v670_v30 = vadd.f32 %v669_v29, %v657_v13 }
 0x1bb   :  { %671 = vadd.xlane.f32.xlu1 %v670_v30 }
 0x244   :  { %v665_v31 = vpop.xlane.xlu0 %664 }
 0x245   :  { %v674_v32 = vmul.f32 0.0013020834, %v665_v31 }
 0x247   :  { %v1224_v33 = vsub.f32 %v495_v59, %v674_v32  ;;  %v1226_v34 = vsub.f32 %v497_v61, %v674_v32  ;;  %v1228_v35 = vsub.f32 %v571_v16, %v674_v32  ;;  %v1230_v37 = vsub.f32 %v573_v18, %v674_v32  ;;  %v776_v18 = vld [vmem:[%s1296_s5] sm:$0x3f]  ;;  %s837_s5 = sshll.u32 %s1079_s4, 4  ;;  %s838_s5 = int_to_ptr.vmem [resolvable:$true] %s837_s5 }
 0x248   :  { %v672_v36 = vpop.xlane.xlu1 %671  ;;  %v680_v41 = vsub.f32 %v649_v10, %v674_v32  ;;  %v681_v47 = vsub.f32 %v651_v23, %v674_v32  ;;  %v752_v16 = vsub.s32 4, %v735_v7  ;;  %v781_v26 = vrot.slane %v776_v18, %v736_v27  ;;  %s1044_s9 = scalar_lea.vmem %s838_s5, 1536  ;;  %p1049_p3 = scmp.lt.s32.totalorder %s838_s5, %s838_s5 }
 0x249   :  { %v675_v38 = vmul.f32 0.0013020834, %v672_v36  ;;  %v688_v39 = vmul.f32 %v1224_v33, %v1224_v33  ;;  %v689_v40 = vmul.f32 %v1226_v34, %v1226_v34  ;;  %v690_v42 = vmul.f32 %v1228_v35, %v1228_v35  ;;  %p1045_p2 = scmp.ne.s32.totalorder %s838_s5, %s1044_s9  ;;  %p1050_p4 = scmp.lt.s32.totalorder %s1044_s9, %s1044_s9 }
 0x24a   :  { %v691_v48 = vmul.f32 %v1230_v37, %v1230_v37  ;;  %v692_v53 = vmul.f32 %v680_v41, %v680_v41  ;;  %v693_v58 = vmul.f32 %v681_v47, %v681_v47  ;;  %v789_v36 = vrot.slane %v776_v18, %v744_v12 }
 0x24b   :  { %v700_v43 = vadd.f32 %v689_v40, %v688_v39  ;;  %v1238_v44 = vsub.f32 %v501_v2, %v675_v38  ;;  %v1240_v45 = vsub.f32 %v503_v15, %v675_v38  ;;  %v1242_v46 = vsub.f32 %v577_v21, %v675_v38  ;;  %p1051_p5 = por %p1050_p4, %p1049_p3 }
 0x24c   :  { %v1246_v50 = vsub.f32 %v579_v24, %v675_v38  ;;  %v1252_v55 = vsub.f32 %v655_v11, %v675_v38  ;;  %v687_v60 = vsub.f32 %v657_v13, %v675_v38  ;;  %v740_v11 = vsub.s32 1, %v735_v7 }
 0x24d   :  { %v701_v49 = vadd.f32 %v700_v43, %v690_v42  ;;  %v694_v51 = vmul.f32 %v1238_v44, %v1238_v44  ;;  %v695_v52 = vmul.f32 %v1240_v45, %v1240_v45  ;;  %v696_v56 = vmul.f32 %v1242_v46, %v1242_v46  ;;  %p1052_p6 = pnand %p1051_p5, %p1045_p2 }
 0x24e   :  { %v697_v61 = vmul.f32 %v1246_v50, %v1246_v50  ;;  %v698_v0 = vmul.f32 %v1252_v55, %v1252_v55  ;;  %v699_v4 = vmul.f32 %v687_v60, %v687_v60  ;;  %v748_v13 = vsub.s32 3, %v735_v7 }
 0x24f   :  { %v702_v54 = vadd.f32 %v701_v49, %v691_v48  ;;  %v707_v57 = vadd.f32 %v695_v52, %v694_v51  ;;  %v741_v20 = vrot.slane %v732_v14, %v740_v11  ;;  %v745_v21 = vrot.slane %v732_v14, %v744_v12 }
 0x250   :  { %v749_v3 = vrot.slane %v732_v14, %v748_v13  ;;  %v753_v24 = vrot.slane %v732_v14, %v752_v16  ;;  %v785_v28 = vrot.slane %v776_v18, %v740_v11  ;;  %v793_v38 = vrot.slane %v776_v18, %v748_v13 }
 0x251   :  { %v703_v59 = vadd.f32 %v702_v54, %v692_v53  ;;  %v708_v62 = vadd.f32 %v707_v57, %v696_v56  ;;  %v797_v42 = vrot.slane %v776_v18, %v752_v16  ;;  %v801_v43 = vrot.slane %v776_v18, %v756_v17 }
 0x253   :  { %v704_v63 = vadd.f32 %v703_v59, %v693_v58  ;;  %v709_v2 = vadd.f32 %v708_v62, %v697_v61 }
 0x255   :  { %705 = vadd.xlane.f32.xlu0 %v704_v63  ;;  %v710_v15 = vadd.f32 %v709_v2, %v698_v0 }
 0x257   :  { %v711_v5 = vadd.f32 %v710_v15, %v699_v4 }
 0x259   :  { %712 = vadd.xlane.f32.xlu0 %v711_v5 }
 0x2e2   :  { %v706_v6 = vpop.xlane.xlu0 %705 }
 0x2e3   :  { %v714_v1 = vmul.f32 0.0013020834, %v706_v6 }
 0x2e5   :  { %v716_v8 = vadd.f32 1e-12, %v714_v1 }
 0x2e6   :  { %v713_v9 = vpop.xlane.xlu0 %712 }
 0x2e7   :  { %996 = vrsqrt.f32 %v716_v8  ;;  %v715_v10 = vmul.f32 0.0013020834, %v713_v9 }
 0x2e9   :  { %v717_v23 = vadd.f32 1e-12, %v715_v10 }
 0x2eb   :  { %998 = vrsqrt.f32 %v717_v23 }
 0x2f1   :  { %v997_v22 = vpop.eup %996 }
 0x2f2   :  { %v720_v29 = vmul.f32 %v997_v22, %v1224_v33  ;;  %v721_v30 = vmul.f32 %v997_v22, %v1226_v34  ;;  %v722_v31 = vmul.f32 %v997_v22, %v1228_v35  ;;  %v723_v32 = vmul.f32 %v997_v22, %v1230_v37 }
 0x2f3   :  { %v724_v39 = vmul.f32 %v997_v22, %v680_v41  ;;  %v725_v40 = vmul.f32 %v997_v22, %v681_v47 }
 0x2f4   :  { %v764_v48 = vmul.f32 %v737_v19, %v720_v29  ;;  %v765_v49 = vmul.f32 %v741_v20, %v721_v30  ;;  %v766_v52 = vmul.f32 %v745_v21, %v722_v31  ;;  %v767_v53 = vmul.f32 %v749_v3, %v723_v32 }
 0x2f5   :  { %v999_v51 = vpop.eup %998  ;;  %v768_v54 = vmul.f32 %v753_v24, %v724_v39  ;;  %v769_v56 = vmul.f32 %v757_v25, %v725_v40 }
 0x2f6   :  { %v726_v33 = vmul.f32 %v999_v51, %v1238_v44  ;;  %v727_v34 = vmul.f32 %v999_v51, %v1240_v45  ;;  %v728_v35 = vmul.f32 %v999_v51, %v1242_v46  ;;  %v729_v37 = vmul.f32 %v999_v51, %v1246_v50 }
 0x2f7   :  { %v730_v41 = vmul.f32 %v999_v51, %v1252_v55  ;;  %v731_v47 = vmul.f32 %v999_v51, %v687_v60  ;;  %v808_v57 = vadd.f32 %v781_v26, %v764_v48  ;;  %v809_v58 = vadd.f32 %v785_v28, %v765_v49 }
 0x2f8   :  { %v770_v59 = vmul.f32 %v737_v19, %v726_v33  ;;  %v771_v61 = vmul.f32 %v741_v20, %v727_v34  ;;  %v772_v62 = vmul.f32 %v745_v21, %v728_v35  ;;  %v773_v63 = vmul.f32 %v749_v3, %v729_v37 }
 0x2f9   :  { %v774_v0 = vmul.f32 %v753_v24, %v730_v41  ;;  %v775_v2 = vmul.f32 %v757_v25, %v731_v47  ;;  %v810_v44 = vadd.f32 %v789_v36, %v766_v52  ;;  %v811_v4 = vadd.f32 %v793_v38, %v767_v53  ;;  %820 = vst [vmem:[#allocation7] sm:$0xff] %v808_v57 }
 0x2fa   :  { %821 = vst [vmem:[#allocation7 + $0x8] sm:$0xff] %v809_v58  ;;  %v812_v45 = vadd.f32 %v797_v42, %v768_v54  ;;  %v813_v46 = vadd.f32 %v801_v43, %v769_v56  ;;  %v814_v50 = vadd.f32 %v781_v26, %v770_v59  ;;  %v815_v15 = vadd.f32 %v785_v28, %v771_v61 }
 0x2fb   :  { %v816_v55 = vadd.f32 %v789_v36, %v772_v62  ;;  %v817_v60 = vadd.f32 %v793_v38, %v773_v63  ;;  %v818_v5 = vadd.f32 %v797_v42, %v774_v0  ;;  %v819_v6 = vadd.f32 %v801_v43, %v775_v2  ;;  %822 = vst [vmem:[#allocation7 + $0x10] sm:$0xff] %v810_v44 }
 0x2fc   :  { %823 = vst [vmem:[#allocation7 + $0x18] sm:$0xff] %v811_v4  ;;  %824 = vst [vmem:[#allocation7 + $0x20] sm:$0xff] %v812_v45 }
 0x2fd   :  { %825 = vst [vmem:[#allocation7 + $0x28] sm:$0xff] %v813_v46  ;;  %826 = vst [vmem:[#allocation7 + $0x30] sm:$0xff] %v814_v50 }
 0x2fe   :  { %827 = vst [vmem:[#allocation7 + $0x38] sm:$0xff] %v815_v15  ;;  %828 = vst [vmem:[#allocation7 + $0x40] sm:$0xff] %v816_v55 }
 0x2ff   :  { %829 = vst [vmem:[#allocation7 + $0x48] sm:$0xff] %v817_v60  ;;  %830 = vst [vmem:[#allocation7 + $0x50] sm:$0xff] %v818_v5 }
 0x300   :  { %831 = vst [vmem:[#allocation7 + $0x58] sm:$0xff] %v819_v6 }
 0x301   :  { %1055 = shalt.err (!%p1052_p6)
}
 0x302   :  { %s1056_s12 = scalar_lea.hbm %s1297_s6, 1536 }
 0x303   :  { %p1057_p7 = scmp.ne.s32.totalorder %s1297_s6, %s1056_s12  ;;  %p1060_p8 = scmp.lt.u32.totalorder %s1056_s12, %s1297_s6 }
 0x305   :  { %p1062_p9 = pnand %p1060_p8, %p1057_p7 }
 0x307   :  { %1065 = shalt.err (!%p1062_p9)
}
 0x308   :  { %843 = dma.vmem_to_hbm [thread:$0]  %s838_s5, 1536, %s1297_s6, [#allocation4], %s1073_s7, %s1073_s7, %s1074_s8  }
 0x309   :  { %1070 = dma.done.wait [#allocation4], 1536  }
 0x30a   :  { %1071 = vsyncadd [#allocation4], 4294965760 }
 0x30b   :  { %847 = vsyncpa [#allocation3], 1 }
 0x30c   :  { %848 = vsyncpa [#allocation6], 1 }
 0x30d   :  { %849 = vsyncpa [#allocation4], 1 }

</bundles_post_ra>
